<compile_context>
chip_gen: v6e
topology: v6e:2x2x1
jax: 0.10.0
libtpu: 0.0.40
codegen_flags: <defaults>
</compile_context>

<pallas_src>
import functools

import jax
import jax.numpy as jnp
from jax.experimental import pallas as pl
from jax.experimental.pallas import tpu as pltpu

_LANE = 128
_SUB = 8


def _vmem_policy():
    """Returns (tile byte budget, vmem_limit_bytes) for the local chip."""
    try:
        vmem = pltpu.get_tpu_info().vmem_capacity_bytes
    except Exception:           # info query unavailable -> conservative default
        vmem = 64 << 20
    if vmem >= (96 << 20):      # v5e / v6e: 128 MiB physical VMEM
        return 48 << 20, 96 << 20
    return 20 << 20, 32 << 20   # v7x: 64 MiB physical, shared by 2 TensorCores


# --------------------------------------------------------------------------
# Kernels
# --------------------------------------------------------------------------
def _bn_train_kernel(x_ref, p_ref, y_ref, rs_ref, *, eps, momentum, inv_n, unbias):
    """Single-pass training path: full batch column (N, TC) resident in VMEM.

    params rows: 0=weight 1=bias 2=running_mean 3=running_var.
    rs rows:     0=new_running_mean 1=new_running_var.
    """
    # True two-pass mean/var inside VMEM (matches torch.var(correction=0),
    # no E[x^2]-mean^2 cancellation).  Re-reading x_ref is a VMEM load — free
    # relative to the HBM-bound roofline of this kernel.
    mean = jnp.sum(x_ref[...], axis=0, keepdims=True, dtype=jnp.float32) * inv_n
    xc = x_ref[...].astype(jnp.float32) - mean                  # (N, TC) fp32 temp
    var = jnp.sum(xc * xc, axis=0, keepdims=True) * inv_n
    scale = p_ref[0:1, :] * jax.lax.rsqrt(var + eps)            # weight * inv_std
    y_ref[...] = (xc * scale + p_ref[1:2, :]).astype(y_ref.dtype)
    rs_ref[0:1, :] = momentum * mean + (1.0 - momentum) * p_ref[2:3, :]
    rs_ref[1:2, :] = momentum * var * unbias + (1.0 - momentum) * p_ref[3:4, :]


def _bn_eval_kernel(x_ref, p_ref, y_ref, *, eps):
    """Eval path: pure fused multiply-add stream over (TN, TC) blocks."""
    scale = p_ref[0:1, :] * jax.lax.rsqrt(p_ref[3:4, :] + eps)
    shift = p_ref[1:2, :] - p_ref[2:3, :] * scale
    y_ref[...] = (x_ref[...].astype(jnp.float32) * scale + shift).astype(y_ref.dtype)


def _bn_stats_kernel(x_ref, p_ref, stats_ref, s1_ref, s2_ref, off_ref,
                     *, eps, momentum, n, unbias, tn, mask_rows):
    """Large-N stats pass: grid (C-blocks, N-blocks), reduction axis last.

    Shifted one-pass sums (offset = first batch row) in VMEM scratch; at the
    last N step emits stats rows: 0=scale 1=shift 2=new_rm 3=new_rv.
    """
    i = pl.program_id(1)

    @pl.when(i == 0)
    def _():
        off_ref[...] = x_ref[0:1, :].astype(jnp.float32)   # stability shift
        s1_ref[...] = jnp.zeros_like(s1_ref)
        s2_ref[...] = jnp.zeros_like(s2_ref)

    xd = x_ref[...].astype(jnp.float32) - off_ref[...]
    if mask_rows:                                          # ragged last N block
        row = i * tn + jax.lax.broadcasted_iota(jnp.int32, xd.shape, 0)
        xd = jnp.where(row < n, xd, 0.0)
    s1_ref[...] += jnp.sum(xd, axis=0, keepdims=True)
    s2_ref[...] += jnp.sum(xd * xd, axis=0, keepdims=True)

    @pl.when(i == pl.num_programs(1) - 1)
    def _():
        inv_n = 1.0 / n
        m1 = s1_ref[...] * inv_n
        mean = off_ref[...] + m1
        var = jnp.maximum(s2_ref[...] * inv_n - m1 * m1, 0.0)
        scale = p_ref[0:1, :] * jax.lax.rsqrt(var + eps)
        stats_ref[0:1, :] = scale
        stats_ref[1:2, :] = p_ref[1:2, :] - mean * scale
        stats_ref[2:3, :] = momentum * mean + (1.0 - momentum) * p_ref[2:3, :]
        stats_ref[3:4, :] = momentum * var * unbias + (1.0 - momentum) * p_ref[3:4, :]


def _bn_apply_kernel(x_ref, stats_ref, y_ref):
    """Large-N apply pass: y = x * scale + shift over a 2-D parallel grid."""
    y_ref[...] = (x_ref[...].astype(jnp.float32) * stats_ref[0:1, :]
                  + stats_ref[1:2, :]).astype(y_ref.dtype)


# --------------------------------------------------------------------------
# Tile selection
# --------------------------------------------------------------------------
def _choose_single_pass_tc(n, c, x_bytes, y_bytes, budget):
    """Widest legal channel block for the full-batch single-pass kernel, or
    None if even an (N, 128) column block blows the budget."""
    c_pad = pl.cdiv(c, _LANE) * _LANE
    # Per channel column per grid step: double-buffered x & y tiles plus ~2
    # full-height fp32 in-kernel temporaries (xc and the xc*xc stream).
    per_col = n * (2 * x_bytes + 2 * y_bytes + 2 * 4)
    max_cols = budget // per_col
    if c <= _LANE:                      # block lane dim must be 128k or full C
        return int(c) if max_cols >= c else None
    tc = (max_cols // _LANE) * _LANE
    if tc < _LANE:
        return None
    tc = min(tc, c_pad)
    if c_pad >= 2 * _LANE:
        # Keep >= 2 channel blocks: feeds both v7x TensorCores and gives the
        # auto-pipeline something to overlap (cheap on 1-TC chips).
        tc = min(tc, pl.cdiv(c_pad // 2, _LANE) * _LANE)
    return int(tc)


def _choose_2d_tiles(n, c, x_bytes, y_bytes, budget, temps_f32=1):
    """(TN, TC) tiles for the 2-D grids (eval / stats / apply)."""
    c_pad = pl.cdiv(c, _LANE) * _LANE
    tc = int(c) if c <= _LANE else min(c_pad, 512)
    per_row = tc * (2 * x_bytes + 2 * y_bytes + temps_f32 * 4)
    tn = (budget // per_row) // _SUB * _SUB
    tn = max(_SUB, min(int(tn), 1024))
    if tn >= n:
        tn = int(n)                     # full-dim block is always legal
    return tn, tc


# --------------------------------------------------------------------------
# Wrapper
# --------------------------------------------------------------------------
def batchnorm1d_forward(x, weight, bias, running_mean, running_var,
                        *, eps=1e-5, momentum=0.1, training=True,
                        force_two_pass=False, tn=None):
    """x: (N, C); weight/bias/running_*: (C,).

    Returns (y, new_running_mean, new_running_var) in training mode,
    (y, running_mean, running_var) in eval mode.
    """
    n, c = x.shape
    x_bytes = jnp.dtype(x.dtype).itemsize
    budget, vmem_limit = _vmem_policy()

    # One small fp32 parameter slab instead of four sub-KiB arrays.
    params = jnp.stack([weight.astype(jnp.float32), bias.astype(jnp.float32),
                        running_mean.astype(jnp.float32),
                        running_var.astype(jnp.float32)])          # (4, C)

    if not training:
        tn_e, tc_e = _choose_2d_tiles(n, c, x_bytes, x_bytes, budget)
        y = pl.pallas_call(
            functools.partial(_bn_eval_kernel, eps=eps),
            out_shape=jax.ShapeDtypeStruct((n, c), x.dtype),
            grid=(pl.cdiv(n, tn_e), pl.cdiv(c, tc_e)),
            in_specs=[pl.BlockSpec((tn_e, tc_e), lambda i, j: (i, j)),
                      pl.BlockSpec((4, tc_e), lambda i, j: (0, j))],
            out_specs=pl.BlockSpec((tn_e, tc_e), lambda i, j: (i, j)),
            compiler_params=pltpu.CompilerParams(
                dimension_semantics=("parallel", "parallel"),
                vmem_limit_bytes=vmem_limit),
        )(x, params)
        return y, running_mean, running_var

    # ---------------- training ----------------
    # TODO(synk): PyTorch errors for n == 1 (unbiased running var is inf); we
    # clamp the unbias factor to 1 instead of raising.
    unbias = n / (n - 1.0) if n > 1 else 1.0
    tc = None if force_two_pass else _choose_single_pass_tc(n, c, x_bytes, x_bytes, budget)

    if tc is not None:
        # Fast path: whole batch column per block, 1-D parallel channel grid.
        y, rs = pl.pallas_call(
            functools.partial(_bn_train_kernel, eps=eps, momentum=momentum,
                              inv_n=1.0 / n, unbias=unbias),
            out_shape=(jax.ShapeDtypeStruct((n, c), x.dtype),
                       jax.ShapeDtypeStruct((2, c), jnp.float32)),
            grid=(pl.cdiv(c, tc),),
            in_specs=[pl.BlockSpec((n, tc), lambda j: (0, j)),
                      pl.BlockSpec((4, tc), lambda j: (0, j))],
            out_specs=(pl.BlockSpec((n, tc), lambda j: (0, j)),
                       pl.BlockSpec((2, tc), lambda j: (0, j))),
            compiler_params=pltpu.CompilerParams(
                dimension_semantics=("parallel",),
                vmem_limit_bytes=vmem_limit),
        )(x, params)
        return (y, rs[0].astype(running_mean.dtype), rs[1].astype(running_var.dtype))

    # Large-N fallback: full-batch column no longer fits VMEM.  Split into a
    # stats pass (reduce over N tiles) + an elementwise apply pass; costs one
    # extra HBM read of x but caps VMEM independent of N.
    tn_s, tc_s = _choose_2d_tiles(n, c, x_bytes, x_bytes, budget, temps_f32=2)
    if tn is not None:
        tn_s = int(tn)
    nb, cb = pl.cdiv(n, tn_s), pl.cdiv(c, tc_s)

    stats = pl.pallas_call(
        functools.partial(_bn_stats_kernel, eps=eps, momentum=momentum, n=n,
                          unbias=unbias, tn=tn_s, mask_rows=(n % tn_s != 0)),
        out_shape=jax.ShapeDtypeStruct((4, c), jnp.float32),
        grid=(cb, nb),                                   # reduction axis last
        in_specs=[pl.BlockSpec((tn_s, tc_s), lambda j, i: (i, j)),
                  pl.BlockSpec((4, tc_s), lambda j, i: (0, j))],
        out_specs=pl.BlockSpec((4, tc_s), lambda j, i: (0, j)),
        scratch_shapes=[pltpu.VMEM((1, tc_s), jnp.float32),
                        pltpu.VMEM((1, tc_s), jnp.float32),
                        pltpu.VMEM((1, tc_s), jnp.float32)],
        compiler_params=pltpu.CompilerParams(
            dimension_semantics=("parallel", "arbitrary"),
            vmem_limit_bytes=vmem_limit),
    )(x, params)

    y = pl.pallas_call(
        _bn_apply_kernel,
        out_shape=jax.ShapeDtypeStruct((n, c), x.dtype),
        grid=(nb, cb),
        in_specs=[pl.BlockSpec((tn_s, tc_s), lambda i, j: (i, j)),
                  pl.BlockSpec((4, tc_s), lambda i, j: (0, j))],
        out_specs=pl.BlockSpec((tn_s, tc_s), lambda i, j: (i, j)),
        compiler_params=pltpu.CompilerParams(
            dimension_semantics=("parallel", "parallel"),
            vmem_limit_bytes=vmem_limit),
    )(x, stats)

    return (y, stats[2].astype(running_mean.dtype), stats[3].astype(running_var.dtype))


# --------------------------------------------------------------------------
# Pure-JAX reference (mirrors the PyTorch module)
# --------------------------------------------------------------------------
def _reference(x, weight, bias, running_mean, running_var,
               eps=1e-5, momentum=0.1, training=True):
    xf = x.astype(jnp.float32)
    n = xf.shape[0]
    if training:
        mean = jnp.mean(xf, axis=0)
        var = jnp.mean((xf - mean[None, :]) ** 2, axis=0)
        new_rm = momentum * mean + (1 - momentum) * running_mean
        new_rv = momentum * var * n / (n - 1.0) + (1 - momentum) * running_var
    else:
        mean, var = running_mean, running_var
        new_rm, new_rv = running_mean, running_var
    y = (xf - mean[None, :]) / jnp.sqrt(var[None, :] + eps)
    y = y * weight[None, :] + bias[None, :]
    return y.astype(x.dtype), new_rm, new_rv


if __name__ == "__main__":
    key = jax.random.PRNGKey(0)
    k1, k2 = jax.random.split(key)

    def init_params(c):
        return (jnp.ones((c,), jnp.float32), jnp.zeros((c,), jnp.float32),
                jnp.zeros((c,), jnp.float32), jnp.ones((c,), jnp.float32))

    # ---- case 1: single-pass training + eval (batch=8, num_features=32) ----
    N, C = 8, 32
    x = jax.random.normal(k1, (N, C), jnp.float32) * 2.0 + 0.5
    w, b, rm, rv = init_params(C)
    y, nrm, nrv = batchnorm1d_forward(x, w, b, rm, rv, training=True)
    jax.block_until_ready((y, nrm, nrv))
    y_r, rm_r, rv_r = _reference(x, w, b, rm, rv, training=True)
    assert jnp.allclose(y, y_r, atol=1e-4, rtol=1e-4)
    assert jnp.allclose(nrm, rm_r, atol=1e-4, rtol=1e-4)
    assert jnp.allclose(nrv, rv_r, atol=1e-4, rtol=1e-4)

    y_e, _, _ = batchnorm1d_forward(x, w, b, nrm, nrv, training=False)
    jax.block_until_ready(y_e)
    y_er, _, _ = _reference(x, w, b, nrm, nrv, training=False)
    assert jnp.allclose(y_e, y_er, atol=1e-4, rtol=1e-4)

    # ---- case 2: ragged channel count (C % 128 != 0 — no wrapper padding) ----
    N2, C2 = 16, 200
    x2 = jax.random.normal(k2, (N2, C2), jnp.float32) - 1.5
    w2, b2, rm2, rv2 = init_params(C2)
    y2, nrm2, nrv2 = batchnorm1d_forward(x2, w2, b2, rm2, rv2, training=True)
    jax.block_until_ready((y2, nrm2, nrv2))
    y2_r, rm2_r, rv2_r = _reference(x2, w2, b2, rm2, rv2, training=True)
    assert jnp.allclose(y2, y2_r, atol=1e-4, rtol=1e-4)
    assert jnp.allclose(nrm2, rm2_r, atol=1e-4, rtol=1e-4)
    assert jnp.allclose(nrv2, rv2_r, atol=1e-4, rtol=1e-4)

    # ---- case 3: large-N fallback (forced at a small shape, ragged N tiles) ----
    N3, C3 = 20, 32
    x3 = jax.random.normal(k1, (N3, C3), jnp.float32) * 3.0 + 4.0
    w3, b3, rm3, rv3 = init_params(C3)
    y3, nrm3, nrv3 = batchnorm1d_forward(x3, w3, b3, rm3, rv3, training=True,
                                         force_two_pass=True, tn=8)
    jax.block_until_ready((y3, nrm3, nrv3))
    y3_r, rm3_r, rv3_r = _reference(x3, w3, b3, rm3, rv3, training=True)
    assert jnp.allclose(y3, y3_r, atol=1e-4, rtol=1e-4)
    assert jnp.allclose(nrm3, rm3_r, atol=1e-4, rtol=1e-4)
    assert jnp.allclose(nrv3, rv3_r, atol=1e-4, rtol=1e-4)

    print("KERNEL_OK")
</pallas_src>

<mosaic_0001>
module attributes {stable_mosaic.version = 11 : i64} {
  func.func @_bn_train_kernel(%arg0: i32, %arg1: memref<8x32xf32, #tpu.memory_space<vmem>>, %arg2: memref<4x32xf32, #tpu.memory_space<vmem>>, %arg3: memref<8x32xf32, #tpu.memory_space<vmem>>, %arg4: memref<2x32xf32, #tpu.memory_space<vmem>>) attributes {dimension_semantics = [#tpu.dimension_semantics<parallel>], iteration_bounds = array<i64: 1>, scalar_prefetch = 0 : i64, scratch_operands = 0 : i64, tpu.core_type = #tpu.core_type<tc>, window_params = [{transform_indices = @transform_0, window_bounds = array<i64: 8, 32>}, {transform_indices = @transform_1, window_bounds = array<i64: 4, 32>}, {transform_indices = @transform_2, window_bounds = array<i64: 8, 32>}, {transform_indices = @transform_3, window_bounds = array<i64: 2, 32>}]} {
    %c0 = arith.constant 0 : index
    %c0_0 = arith.constant 0 : index
    %0 = vector.load %arg1[%c0, %c0_0] : memref<8x32xf32, #tpu.memory_space<vmem>>, vector<8x32xf32>
    %cst = arith.constant dense<0.000000e+00> : vector<32xf32>
    %1 = vector.multi_reduction <add>, %0, %cst [0] : vector<8x32xf32> to vector<32xf32>
    %2 = vector.shape_cast %1 : vector<32xf32> to vector<1x32xf32>
    %cst_1 = arith.constant 1.250000e-01 : f32
    %3 = vector.broadcast %cst_1 : f32 to vector<1x32xf32>
    %4 = arith.mulf %2, %3 : vector<1x32xf32>
    %c0_2 = arith.constant 0 : index
    %c0_3 = arith.constant 0 : index
    %5 = vector.load %arg1[%c0_2, %c0_3] : memref<8x32xf32, #tpu.memory_space<vmem>>, vector<8x32xf32>
    %6 = vector.broadcast %4 : vector<1x32xf32> to vector<8x32xf32>
    %7 = arith.subf %5, %6 : vector<8x32xf32>
    %8 = arith.mulf %7, %7 : vector<8x32xf32>
    %cst_4 = arith.constant dense<0.000000e+00> : vector<32xf32>
    %9 = vector.multi_reduction <add>, %8, %cst_4 [0] : vector<8x32xf32> to vector<32xf32>
    %10 = vector.shape_cast %9 : vector<32xf32> to vector<1x32xf32>
    %cst_5 = arith.constant 1.250000e-01 : f32
    %11 = vector.broadcast %cst_5 : f32 to vector<1x32xf32>
    %12 = arith.mulf %10, %11 : vector<1x32xf32>
    %c0_6 = arith.constant 0 : index
    %c0_7 = arith.constant 0 : index
    %13 = vector.load %arg2[%c0_6, %c0_7] : memref<4x32xf32, #tpu.memory_space<vmem>>, vector<1x32xf32>
    %cst_8 = arith.constant 9.99999974E-6 : f32
    %14 = vector.broadcast %cst_8 : f32 to vector<1x32xf32>
    %15 = arith.addf %12, %14 : vector<1x32xf32>
    %16 = math.rsqrt %15 : vector<1x32xf32>
    %17 = arith.mulf %13, %16 : vector<1x32xf32>
    %18 = vector.broadcast %17 : vector<1x32xf32> to vector<8x32xf32>
    %19 = arith.mulf %7, %18 : vector<8x32xf32>
    %c1 = arith.constant 1 : index
    %c0_9 = arith.constant 0 : index
    %20 = vector.load %arg2[%c1, %c0_9] : memref<4x32xf32, #tpu.memory_space<vmem>>, vector<1x32xf32>
    %21 = vector.broadcast %20 : vector<1x32xf32> to vector<8x32xf32>
    %22 = arith.addf %19, %21 : vector<8x32xf32>
    %c0_10 = arith.constant 0 : index
    %c0_11 = arith.constant 0 : index
    %23 = vector.load %arg3[%c0_10, %c0_11] : memref<8x32xf32, #tpu.memory_space<vmem>>, vector<8x32xf32>
    tpu.vector_store %arg3[%c0_10, %c0_11], %22 {strides = array<i32>} : memref<8x32xf32, #tpu.memory_space<vmem>>, vector<8x32xf32>,
    %cst_12 = arith.constant 1.000000e-01 : f32
    %24 = vector.broadcast %cst_12 : f32 to vector<1x32xf32>
    %25 = arith.mulf %24, %4 : vector<1x32xf32>
    %c2 = arith.constant 2 : index
    %c0_13 = arith.constant 0 : index
    %26 = vector.load %arg2[%c2, %c0_13] : memref<4x32xf32, #tpu.memory_space<vmem>>, vector<1x32xf32>
    %cst_14 = arith.constant 0.899999976 : f32
    %27 = vector.broadcast %cst_14 : f32 to vector<1x32xf32>
    %28 = arith.mulf %27, %26 : vector<1x32xf32>
    %29 = arith.addf %25, %28 : vector<1x32xf32>
    %c0_15 = arith.constant 0 : index
    %c0_16 = arith.constant 0 : index
    %30 = vector.load %arg4[%c0_15, %c0_16] : memref<2x32xf32, #tpu.memory_space<vmem>>, vector<1x32xf32>
    tpu.vector_store %arg4[%c0_15, %c0_16], %29 {strides = array<i32>} : memref<2x32xf32, #tpu.memory_space<vmem>>, vector<1x32xf32>,
    %cst_17 = arith.constant 1.000000e-01 : f32
    %31 = vector.broadcast %cst_17 : f32 to vector<1x32xf32>
    %32 = arith.mulf %31, %12 : vector<1x32xf32>
    %cst_18 = arith.constant 1.14285719 : f32
    %33 = vector.broadcast %cst_18 : f32 to vector<1x32xf32>
    %34 = arith.mulf %32, %33 : vector<1x32xf32>
    %c3 = arith.constant 3 : index
    %c0_19 = arith.constant 0 : index
    %35 = vector.load %arg2[%c3, %c0_19] : memref<4x32xf32, #tpu.memory_space<vmem>>, vector<1x32xf32>
    %cst_20 = arith.constant 0.899999976 : f32
    %36 = vector.broadcast %cst_20 : f32 to vector<1x32xf32>
    %37 = arith.mulf %36, %35 : vector<1x32xf32>
    %38 = arith.addf %34, %37 : vector<1x32xf32>
    %c1_21 = arith.constant 1 : index
    %c0_22 = arith.constant 0 : index
    %39 = vector.load %arg4[%c1_21, %c0_22] : memref<2x32xf32, #tpu.memory_space<vmem>>, vector<1x32xf32>
    tpu.vector_store %arg4[%c1_21, %c0_22], %38 {strides = array<i32>} : memref<2x32xf32, #tpu.memory_space<vmem>>, vector<1x32xf32>,
    return
  }
  func.func @transform_0(%arg0: i32) -> (i32, i32) {
    %c0_i32 = arith.constant 0 : i32
    %c0_i32_0 = arith.constant 0 : i32
    return %c0_i32, %arg0 : i32, i32
  }
  func.func @transform_1(%arg0: i32) -> (i32, i32) {
    %c0_i32 = arith.constant 0 : i32
    %c0_i32_0 = arith.constant 0 : i32
    return %c0_i32, %arg0 : i32, i32
  }
  func.func @transform_2(%arg0: i32) -> (i32, i32) {
    %c0_i32 = arith.constant 0 : i32
    %c0_i32_0 = arith.constant 0 : i32
    return %c0_i32, %arg0 : i32, i32
  }
  func.func @transform_3(%arg0: i32) -> (i32, i32) {
    %c0_i32 = arith.constant 0 : i32
    %c0_i32_0 = arith.constant 0 : i32
    return %c0_i32, %arg0 : i32, i32
  }
}

</mosaic_0001>

<bundles_post_ra>
// kernel: tpu_custom_call.1
= control target key start
LH: loop header
LB: loop body
LE: loop exit
PB: predicated region body
PF: predicated region fallthrough
CT: control target
= control target key end

     0   :  { %9 = vsyncpa [#allocation3], 0  ;;  %s253_s0 = inlined_call_operand.hbm [shape: f32[8,32], index: 0, kind: input, shape index: {}]   ;;  %s254_s1 = inlined_call_operand.hbm [shape: f32[4,32], index: 1, kind: input, shape index: {}]   ;;  %s255_s2 = inlined_call_operand.hbm [shape: f32[8,32], index: 2, kind: output, shape index: {0}]   ;;  %s256_s3 = inlined_call_operand.hbm [shape: f32[2,32], index: 3, kind: output, shape index: {1}]  }
   0x1   :  { %10 = vsyncpa [#allocation6], 0 }
   0x2   :  { %11 = vsyncpa [#allocation4], 0 }
   0x3   :  { %12 = vsyncpa [#allocation9], 0  ;;  %s212_s12 = smov [#allocation2]   ;;  %s213_s14 = smov [#allocation5]  }
   0x4   :  { %s19_s13 = sshll.u32 %s212_s12, 4  ;;  %s29_s15 = sshll.u32 %s213_s14, 4  ;;  %s20_s13 = int_to_ptr.vmem [resolvable:$true] %s19_s13  ;;  %s30_s15 = int_to_ptr.vmem [resolvable:$true] %s29_s15 }
   0x5   :  { %s132_s16 = scalar_lea.vmem %s20_s13, 128  ;;  %p137_p1 = scmp.lt.s32.totalorder %s20_s13, %s20_s13 }
   0x6   :  { %p133_p0 = scmp.ne.s32.totalorder %s20_s13, %s132_s16  ;;  %p138_p2 = scmp.lt.s32.totalorder %s132_s16, %s132_s16 }
   0x8   :  { %p139_p3 = por %p138_p2, %p137_p1 }
   0xa   :  { %p140_p4 = pnand %p139_p3, %p133_p0 }
   0xc   :  { %143 = shalt.err (!%p140_p4)
}
   0xd   :  { %22 = dma.hbm_to_vmem [thread:$0]  %s253_s0, 128, %s20_s13, [#allocation3]  }
   0xe   :  { %s152_s19 = scalar_lea.vmem %s30_s15, 64  ;;  %p157_p6 = scmp.lt.s32.totalorder %s30_s15, %s30_s15 }
   0xf   :  { %p153_p5 = scmp.ne.s32.totalorder %s30_s15, %s152_s19  ;;  %p158_p7 = scmp.lt.s32.totalorder %s152_s19, %s152_s19 }
  0x11   :  { %p159_p8 = por %p158_p7, %p157_p6 }
  0x13   :  { %p160_p9 = pnand %p159_p8, %p153_p5 }
  0x15   :  { %163 = shalt.err (!%p160_p9)
}
  0x16   :  { %32 = dma.hbm_to_vmem [thread:$0]  %s254_s1, 64, %s30_s15, [#allocation6]  }
  0x17   :  { %204 = dma.done.wait [#allocation3], 128  }
  0x18   :  { %205 = vsyncadd [#allocation3], 4294967168 }
  0x19   :  { %206 = dma.done.wait [#allocation6], 64  }
  0x1a   :  { %207 = vsyncadd [#allocation6], 4294967232  ;;  %vm40_vm0 = vcmask 261120   ;;  %v39_v0 = vld [vmem:[#allocation2] sm:$0xff]  ;;  %v76_v7 = vld [vmem:[#allocation5 + $0x2] sm:$0x1]  ;;  %v63_v29 = vlaneseq }
  0x1b   :  { %v41_v1 = vsel %vm40_vm0, %v39_v0, 0.0  ;;  %v77_v10 = vmul.f32 0.9, %v76_v7  ;;  %vm79_vm1 = vcmask 253952   ;;  %v83_v22 = vld [vmem:[#allocation5 + $0x3] sm:$0x1] }
  0x1c   :  { %v42_v2 = vrot.slane %v41_v1, 4  ;;  %v84_v26 = vmul.f32 0.9, %v83_v22  ;;  %s214_s0 = smov [#allocation8]  }
  0x1d   :  { %s103_s1 = sshll.u32 %s214_s0, 4  ;;  %s104_s1 = int_to_ptr.vmem [resolvable:$true] %s103_s1 }
  0x1e   :  { %v43_v3 = vadd.f32 %v42_v2, %v41_v1  ;;  %s164_s22 = scalar_lea.vmem %s104_s1, 32  ;;  %p169_p11 = scmp.lt.s32.totalorder %s104_s1, %s104_s1 }
  0x1f   :  { %p165_p10 = scmp.ne.s32.totalorder %s104_s1, %s164_s22  ;;  %p170_p12 = scmp.lt.s32.totalorder %s164_s22, %s164_s22 }
  0x20   :  { %v44_v4 = vrot.slane %v43_v3, 2 }
  0x21   :  { %p171_p13 = por %p170_p12, %p169_p11 }
  0x22   :  { %v45_v5 = vadd.f32 %v44_v4, %v43_v3 }
  0x23   :  { %p172_p0 = pnand %p171_p13, %p165_p10 }
  0x24   :  { %v46_v6 = vrot.slane %v45_v5, 1 }
  0x26   :  { %v47_v8 = vadd.f32 %v46_v6, %v45_v5 }
  0x28   :  { %v48_v9 = vmul.f32 0.125, %v47_v8 }
  0x2a   :  { %v49_v11 = vsub.f32 %v39_v0, %v48_v9  ;;  %v75_v12 = vmul.f32 0.1, %v48_v9 }
  0x2c   :  { %v50_v13 = vmul.f32 %v49_v11, %v49_v11  ;;  %v78_v14 = vadd.f32 %v77_v10, %v75_v12 }
  0x2e   :  { %v51_v15 = vsel %vm40_vm0, %v50_v13, 0.0  ;;  %80 = vst.msk [vmem:[#allocation8] sm:$0x1] %vm79_vm1, %v78_v14 }
  0x2f   :  { %v52_v16 = vrot.slane %v51_v15, 4 }
  0x31   :  { %v53_v17 = vadd.f32 %v52_v16, %v51_v15 }
  0x33   :  { %v54_v18 = vrot.slane %v53_v17, 2 }
  0x35   :  { %v55_v19 = vadd.f32 %v54_v18, %v53_v17 }
  0x37   :  { %v56_v20 = vrot.slane %v55_v19, 1 }
  0x39   :  { %v57_v21 = vadd.f32 %v56_v20, %v55_v19 }
  0x3b   :  { %v58_v23 = vmul.f32 0.125, %v57_v21 }
  0x3d   :  { %v60_v24 = vadd.f32 1e-05, %v58_v23  ;;  %v81_v25 = vmul.f32 0.1, %v58_v23 }
  0x3f   :  { %122 = vrsqrt.f32 %v60_v24  ;;  %v82_v27 = vmul.f32 1.1428572, %v81_v25 }
  0x41   :  { %v85_v28 = vadd.f32 %v84_v26, %v82_v27 }
  0x43   :  { %86 = vst.msk [vmem:[#allocation8 + $0x1] sm:$0x1] %vm79_vm1, %v85_v28 }
  0x44   :  { %175 = shalt.err (!%p172_p0)
}
  0x45   :  { %106 = dma.vmem_to_hbm [thread:$0]  %s104_s1, 32, %s256_s3, [#allocation9]   ;;  %v64_v30 = vshrl.u32 %v63_v29, 7  ;;  %v59_v31 = vld [vmem:[#allocation5] sm:$0x1] }
  0x46   :  { %v117_v36 = vld [vmem:[#allocation5 + $0x1] ss:$0 sm:$0xff]  ;;  %s215_s25 = smov [#allocation7]  }
  0x47   :  { %v65_v32 = vsub.s32 0, %v64_v30  ;;  %s93_s26 = sshll.u32 %s215_s25, 4  ;;  %s94_s26 = int_to_ptr.vmem [resolvable:$true] %s93_s26 }
  0x48   :  { %s184_s27 = scalar_lea.vmem %s94_s26, 128  ;;  %p189_p2 = scmp.lt.s32.totalorder %s94_s26, %s94_s26 }
  0x49   :  { %p185_p1 = scmp.ne.s32.totalorder %s94_s26, %s184_s27  ;;  %p190_p3 = scmp.lt.s32.totalorder %s184_s27, %s184_s27 }
  0x4b   :  { %p191_p4 = por %p190_p3, %p189_p2 }
  0x4c   :  { %v123_v33 = vpop.eup %122 }
  0x4d   :  { %v62_v34 = vmul.f32 %v123_v33, %v59_v31  ;;  %p192_p5 = pnand %p191_p4, %p185_p1 }
  0x4f   :  { %v66_v35 = vrot.slane %v62_v34, %v65_v32 }
  0x51   :  { %v67_v37 = vmul.f32 %v66_v35, %v49_v11 }
  0x53   :  { %v73_v38 = vadd.f32 %v117_v36, %v67_v37 }
  0x55   :  { %74 = vst.msk [vmem:[#allocation7] sm:$0xff] %vm40_vm0, %v73_v38 }
  0x56   :  { %195 = shalt.err (!%p192_p5)
}
  0x57   :  { %96 = dma.vmem_to_hbm [thread:$0]  %s94_s26, 128, %s255_s2, [#allocation4]  }
  0x58   :  { %208 = dma.done.wait [#allocation4], 128  }
  0x59   :  { %209 = vsyncadd [#allocation4], 4294967168 }
  0x5a   :  { %210 = dma.done.wait [#allocation9], 32  }
  0x5b   :  { %211 = vsyncadd [#allocation9], 4294967264 }
  0x5c   :  { %113 = vsyncpa [#allocation3], 1 }
  0x5d   :  { %114 = vsyncpa [#allocation6], 1 }
  0x5e   :  { %115 = vsyncpa [#allocation4], 1 }
  0x5f   :  { %116 = vsyncpa [#allocation9], 1 }

</bundles_post_ra>
